<compile_context>
chip_gen: v7x
topology: tpu7x:2x2x1
jax: 0.10.0
libtpu: 0.0.40
codegen_flags: <defaults>
</compile_context>

<pallas_src>
import jax
import jax.numpy as jnp
from jax import lax
from jax.experimental import pallas as pl
from jax.experimental.pallas import tpu as pltpu


def _fbank_aug_kernel(params_ref, x_ref, o_ref):
    # params_ref: SMEM int32 (4, B_pad); rows = [f_pos, f_len, t_pos, t_len].
    # x_ref / o_ref: VMEM (Bb, F, T) tile holding Bb batch rows.
    blk = pl.program_id(0)
    Bb, F, T = x_ref.shape

    # Small iotas built once per tile; broadcast against each other per row.
    f_idx = lax.broadcasted_iota(jnp.int32, (F, 1), 0)   # sublane iota
    t_idx = lax.broadcasted_iota(jnp.int32, (1, T), 1)   # lane iota
    zero = jnp.zeros((), dtype=o_ref.dtype)

    def body(i, carry):
        gb = blk * Bb + i
        f_pos = params_ref[0, gb]
        f_len = params_ref[1, gb]
        t_pos = params_ref[2, gb]
        t_len = params_ref[3, gb]
        freq_mask = (f_idx >= f_pos) & (f_idx < f_pos + f_len)   # (F, 1)
        time_mask = (t_idx >= t_pos) & (t_idx < t_pos + t_len)   # (1, T)
        row = x_ref[i]                                           # (F, T)
        # Two nested selects instead of materializing the OR'ed (F, T) mask.
        row = jnp.where(time_mask, zero, row)
        row = jnp.where(freq_mask, zero, row)
        o_ref[i] = row
        return carry

    lax.fori_loop(0, Bb, body, None, unroll=2)


def _make_mask_params(key, batch, F, T,
                      freq_mask_width=(0, 8), time_mask_width=(0, 10)):
    """Replicates torch.randint semantics:
       mask_len ~ U[lo, hi)  (per batch)
       mask_pos ~ U[0, max(1, D - mask_len.max()))  (per batch)
       Returns int32 (4, batch) = [f_pos; f_len; t_pos; t_len]."""
    k_tl, k_tp, k_fl, k_fp = jax.random.split(key, 4)

    t_len = jax.random.randint(k_tl, (batch,), time_mask_width[0],
                               time_mask_width[1], dtype=jnp.int32)
    t_hi = jnp.maximum(1, T - jnp.max(t_len))
    t_pos = jax.random.randint(k_tp, (batch,), 0, t_hi, dtype=jnp.int32)

    f_len = jax.random.randint(k_fl, (batch,), freq_mask_width[0],
                               freq_mask_width[1], dtype=jnp.int32)
    f_hi = jnp.maximum(1, F - jnp.max(f_len))
    f_pos = jax.random.randint(k_fp, (batch,), 0, f_hi, dtype=jnp.int32)

    return jnp.stack([f_pos, f_len, t_pos, t_len], axis=0)  # (4, batch) int32


def fbank_aug(x, key, freq_mask_width=(0, 8), time_mask_width=(0, 10),
              target_tile_bytes=2 << 20):
    """SpecAugment-style freq + time masking of x (batch, F, T).

    Callers should donate x (jax.jit(..., donate_argnums=...)) so the output
    aliases x and the op runs in place (no second B*F*T HBM buffer)."""
    batch, F, T = x.shape
    params = _make_mask_params(key, batch, F, T, freq_mask_width, time_mask_width)

    # Block Bb batch rows per grid step: ~target_tile_bytes per tile, capped at
    # 16 rows, and capped so the 'parallel' grid axis has >= 2 blocks (v7x has
    # two TensorCores sharing the grid on a bandwidth-bound kernel).
    bytes_per_row = F * T * x.dtype.itemsize
    Bb = int(max(1, min(batch, target_tile_bytes // bytes_per_row, 16)))
    if batch >= 2:
        Bb = min(Bb, max(1, batch // 2))
    n_blocks = int(pl.cdiv(batch, Bb))
    B_pad = n_blocks * Bb

    # Pad ONLY the tiny params array (zero-length masks for the padded rows);
    # the tail batch block of x itself is handled by Pallas boundary masking.
    params_p = params
    if B_pad != batch:
        params_p = jnp.pad(params, ((0, 0), (0, B_pad - batch)))

    tile_bytes = Bb * F * T * x.dtype.itemsize
    vmem_need = 4 * tile_bytes            # double-buffered input + output
    vmem_limit = int(min(max(vmem_need + (2 << 20), 16 << 20), 48 << 20))
    assert vmem_need <= vmem_limit, "tile too large for scoped VMEM"

    return pl.pallas_call(
        _fbank_aug_kernel,
        out_shape=jax.ShapeDtypeStruct((batch, F, T), x.dtype),
        grid_spec=pltpu.PrefetchScalarGridSpec(
            num_scalar_prefetch=1,          # params -> SMEM, visible to kernel
            grid=(n_blocks,),
            in_specs=[pl.BlockSpec((Bb, F, T), lambda b, params: (b, 0, 0))],
            out_specs=pl.BlockSpec((Bb, F, T), lambda b, params: (b, 0, 0)),
        ),
        # Operand index counts the scalar-prefetch arg: params = 0, x = 1.
        input_output_aliases={1: 0},
        compiler_params=pltpu.CompilerParams(
            dimension_semantics=("parallel",),
            vmem_limit_bytes=vmem_limit),
    )(params_p, x)


def _reference(x, params):
    # Pure-JAX reference of the same masking for correctness check.
    batch, F, T = x.shape
    f_pos = params[0][:, None, None]
    f_len = params[1][:, None, None]
    t_pos = params[2][:, None, None]
    t_len = params[3][:, None, None]
    f_idx = jnp.arange(F)[None, :, None]
    t_idx = jnp.arange(T)[None, None, :]
    freq_mask = (f_idx >= f_pos) & (f_idx < f_pos + f_len)
    time_mask = (t_idx >= t_pos) & (t_idx < t_pos + t_len)
    mask = freq_mask | time_mask
    return jnp.where(mask, jnp.zeros((), x.dtype), x)


if __name__ == "__main__":
    key = jax.random.PRNGKey(0)
    k_x, k_mask = jax.random.split(key)

    # Small fbank-like shapes: batch=5 is not a multiple of the 2-row block
    # (exercises the params-padding + tail-block boundary path); T=200 is not a
    # multiple of 128 (exercises the full-T, no-lane-padding block path).
    batch, F, T = 5, 80, 200
    x = jax.random.normal(k_x, (batch, F, T), dtype=jnp.float32)
    x_shape, x_dtype = x.shape, x.dtype

    # Reference computed from the same deterministic params, fully materialized
    # before x is donated to the kernel call below.
    params = _make_mask_params(k_mask, batch, F, T)
    ref = jax.block_until_ready(_reference(x, params))

    fbank_aug_donated = jax.jit(fbank_aug, donate_argnums=(0,))
    out = fbank_aug_donated(x, k_mask)
    out = jax.block_until_ready(out)

    assert out.shape == x_shape and out.dtype == x_dtype
    assert jnp.allclose(out, ref), "Pallas output mismatch vs reference"

    print("KERNEL_OK")
</pallas_src>

<mosaic_0001>
module attributes {stable_mosaic.version = 11 : i64} {
  func.func @_fbank_aug_kernel(%arg0: i32, %arg1: memref<4x6xi32, #tpu.memory_space<smem>>, %arg2: memref<2x80x200xf32, #tpu.memory_space<vmem>>, %arg3: memref<2x80x200xf32, #tpu.memory_space<vmem>>) attributes {dimension_semantics = [#tpu.dimension_semantics<parallel>], iteration_bounds = array<i64: 3>, scalar_prefetch = 1 : i64, scratch_operands = 0 : i64, tpu.core_type = #tpu.core_type<tc>, window_params = [{transform_indices = @transform_0, window_bounds = array<i64: 2, 80, 200>}, {transform_indices = @transform_1, window_bounds = array<i64: 2, 80, 200>}]} {
    %0 = tpu.iota {dimensions = array<i32: 0>} : vector<80x1xi32>
    %1 = tpu.iota {dimensions = array<i32: 1>} : vector<1x200xi32>
    %cst = arith.constant 0.000000e+00 : f32
    %c0_i32 = arith.constant 0 : i32
    %c2_i32 = arith.constant 2 : i32
    %2 = arith.muli %arg0, %c2_i32 : i32
    %3 = arith.addi %2, %c0_i32 : i32
    %c0 = arith.constant 0 : index
    %4 = arith.index_cast %3 : i32 to index
    %5 = memref.load %arg1[%c0, %4] : memref<4x6xi32, #tpu.memory_space<smem>>
    %c1 = arith.constant 1 : index
    %6 = arith.index_cast %3 : i32 to index
    %7 = memref.load %arg1[%c1, %6] : memref<4x6xi32, #tpu.memory_space<smem>>
    %c2 = arith.constant 2 : index
    %8 = arith.index_cast %3 : i32 to index
    %9 = memref.load %arg1[%c2, %8] : memref<4x6xi32, #tpu.memory_space<smem>>
    %c3 = arith.constant 3 : index
    %10 = arith.index_cast %3 : i32 to index
    %11 = memref.load %arg1[%c3, %10] : memref<4x6xi32, #tpu.memory_space<smem>>
    %12 = vector.broadcast %5 : i32 to vector<80x1xi32>
    %13 = arith.cmpi sge, %0, %12 : vector<80x1xi32>
    %14 = arith.addi %5, %7 : i32
    %15 = vector.broadcast %14 : i32 to vector<80x1xi32>
    %16 = arith.cmpi slt, %0, %15 : vector<80x1xi32>
    %17 = arith.andi %13, %16 : vector<80x1xi1>
    %18 = vector.broadcast %9 : i32 to vector<1x200xi32>
    %19 = arith.cmpi sge, %1, %18 : vector<1x200xi32>
    %20 = arith.addi %9, %11 : i32
    %21 = vector.broadcast %20 : i32 to vector<1x200xi32>
    %22 = arith.cmpi slt, %1, %21 : vector<1x200xi32>
    %23 = arith.andi %19, %22 : vector<1x200xi1>
    %24 = arith.index_cast %c0_i32 : i32 to index
    %c0_0 = arith.constant 0 : index
    %c0_1 = arith.constant 0 : index
    %25 = vector.load %arg2[%24, %c0_0, %c0_1] : memref<2x80x200xf32, #tpu.memory_space<vmem>>, vector<1x80x200xf32>
    %26 = vector.shape_cast %25 : vector<1x80x200xf32> to vector<80x200xf32>
    %27 = vector.shape_cast %23 : vector<1x200xi1> to vector<1x200xi1>
    %28 = vector.broadcast %27 : vector<1x200xi1> to vector<80x200xi1>
    %29 = vector.broadcast %cst : f32 to vector<80x200xf32>
    %30 = arith.select %28, %29, %26 : vector<80x200xi1>, vector<80x200xf32>
    %31 = vector.shape_cast %17 : vector<80x1xi1> to vector<80x1xi1>
    %32 = vector.broadcast %31 : vector<80x1xi1> to vector<80x200xi1>
    %33 = vector.broadcast %cst : f32 to vector<80x200xf32>
    %34 = arith.select %32, %33, %30 : vector<80x200xi1>, vector<80x200xf32>
    %35 = arith.index_cast %c0_i32 : i32 to index
    %c0_2 = arith.constant 0 : index
    %c0_3 = arith.constant 0 : index
    %36 = vector.load %arg3[%35, %c0_2, %c0_3] : memref<2x80x200xf32, #tpu.memory_space<vmem>>, vector<1x80x200xf32>
    %37 = vector.shape_cast %36 : vector<1x80x200xf32> to vector<80x200xf32>
    %38 = vector.shape_cast %34 : vector<80x200xf32> to vector<1x80x200xf32>
    tpu.vector_store %arg3[%35, %c0_2, %c0_3], %38 {strides = array<i32>} : memref<2x80x200xf32, #tpu.memory_space<vmem>>, vector<1x80x200xf32>,
    %c1_i32 = arith.constant 1 : i32
    %c2_i32_4 = arith.constant 2 : i32
    %39 = arith.muli %arg0, %c2_i32_4 : i32
    %40 = arith.addi %39, %c1_i32 : i32
    %c0_5 = arith.constant 0 : index
    %41 = arith.index_cast %40 : i32 to index
    %42 = memref.load %arg1[%c0_5, %41] : memref<4x6xi32, #tpu.memory_space<smem>>
    %c1_6 = arith.constant 1 : index
    %43 = arith.index_cast %40 : i32 to index
    %44 = memref.load %arg1[%c1_6, %43] : memref<4x6xi32, #tpu.memory_space<smem>>
    %c2_7 = arith.constant 2 : index
    %45 = arith.index_cast %40 : i32 to index
    %46 = memref.load %arg1[%c2_7, %45] : memref<4x6xi32, #tpu.memory_space<smem>>
    %c3_8 = arith.constant 3 : index
    %47 = arith.index_cast %40 : i32 to index
    %48 = memref.load %arg1[%c3_8, %47] : memref<4x6xi32, #tpu.memory_space<smem>>
    %49 = vector.broadcast %42 : i32 to vector<80x1xi32>
    %50 = arith.cmpi sge, %0, %49 : vector<80x1xi32>
    %51 = arith.addi %42, %44 : i32
    %52 = vector.broadcast %51 : i32 to vector<80x1xi32>
    %53 = arith.cmpi slt, %0, %52 : vector<80x1xi32>
    %54 = arith.andi %50, %53 : vector<80x1xi1>
    %55 = vector.broadcast %46 : i32 to vector<1x200xi32>
    %56 = arith.cmpi sge, %1, %55 : vector<1x200xi32>
    %57 = arith.addi %46, %48 : i32
    %58 = vector.broadcast %57 : i32 to vector<1x200xi32>
    %59 = arith.cmpi slt, %1, %58 : vector<1x200xi32>
    %60 = arith.andi %56, %59 : vector<1x200xi1>
    %61 = arith.index_cast %c1_i32 : i32 to index
    %c0_9 = arith.constant 0 : index
    %c0_10 = arith.constant 0 : index
    %62 = vector.load %arg2[%61, %c0_9, %c0_10] : memref<2x80x200xf32, #tpu.memory_space<vmem>>, vector<1x80x200xf32>
    %63 = vector.shape_cast %62 : vector<1x80x200xf32> to vector<80x200xf32>
    %64 = vector.shape_cast %60 : vector<1x200xi1> to vector<1x200xi1>
    %65 = vector.broadcast %64 : vector<1x200xi1> to vector<80x200xi1>
    %66 = vector.broadcast %cst : f32 to vector<80x200xf32>
    %67 = arith.select %65, %66, %63 : vector<80x200xi1>, vector<80x200xf32>
    %68 = vector.shape_cast %54 : vector<80x1xi1> to vector<80x1xi1>
    %69 = vector.broadcast %68 : vector<80x1xi1> to vector<80x200xi1>
    %70 = vector.broadcast %cst : f32 to vector<80x200xf32>
    %71 = arith.select %69, %70, %67 : vector<80x200xi1>, vector<80x200xf32>
    %72 = arith.index_cast %c1_i32 : i32 to index
    %c0_11 = arith.constant 0 : index
    %c0_12 = arith.constant 0 : index
    %73 = vector.load %arg3[%72, %c0_11, %c0_12] : memref<2x80x200xf32, #tpu.memory_space<vmem>>, vector<1x80x200xf32>
    %74 = vector.shape_cast %73 : vector<1x80x200xf32> to vector<80x200xf32>
    %75 = vector.shape_cast %71 : vector<80x200xf32> to vector<1x80x200xf32>
    tpu.vector_store %arg3[%72, %c0_11, %c0_12], %75 {strides = array<i32>} : memref<2x80x200xf32, #tpu.memory_space<vmem>>, vector<1x80x200xf32>,
    %c2_i32_13 = arith.constant 2 : i32
    return
  }
  func.func @transform_0(%arg0: i32, %arg1: memref<4x6xi32, #tpu.memory_space<smem>>) -> (i32, i32, i32) {
    %c0_i32 = arith.constant 0 : i32
    %c0_i32_0 = arith.constant 0 : i32
    %c0_i32_1 = arith.constant 0 : i32
    return %arg0, %c0_i32, %c0_i32_0 : i32, i32, i32
  }
  func.func @transform_1(%arg0: i32, %arg1: memref<4x6xi32, #tpu.memory_space<smem>>) -> (i32, i32, i32) {
    %c0_i32 = arith.constant 0 : i32
    %c0_i32_0 = arith.constant 0 : i32
    %c0_i32_1 = arith.constant 0 : i32
    return %arg0, %c0_i32, %c0_i32_0 : i32, i32, i32
  }
}

</mosaic_0001>

<bundles_post_ra>
// kernel: fbank_aug.1
= control target key start
LH: loop header
LB: loop body
LE: loop exit
PB: predicated region body
PF: predicated region fallthrough
CT: control target
= control target key end

     0   :  { %s1610_s0 = inlined_call_operand.vmem [shape: s32[4,6], index: 0, kind: input, shape index: {}]   ;;  %s1611_s1 = inlined_call_operand.hbm [shape: f32[5,80,200], index: 1, kind: input, shape index: {}, may-alias: {1,2}]   ;;  %s1612_s2 = inlined_call_operand.hbm [shape: f32[5,80,200], index: 2, kind: output, shape index: {}, may-alias: {1,2}]  }
   0x1   :  { %s7_s11 = sshll.u32 %s1610_s0, 4  ;;  %s8_s11 = int_to_ptr.vmem [resolvable:$true] %s7_s11 }
   0x2   :  { %s739_s12 = scalar_lea.vmem %s8_s11, 64  ;;  %p744_p1 = scmp.lt.s32.totalorder %s8_s11, %s8_s11 }
   0x3   :  { %p740_p0 = scmp.ne.s32.totalorder %s8_s11, %s739_s12  ;;  %p745_p2 = scmp.lt.s32.totalorder %s739_s12, %s739_s12 }
   0x5   :  { %p746_p3 = por %p745_p2, %p744_p1 }
   0x7   :  { %p747_p4 = pnand %p746_p3, %p740_p0 }
   0x9   :  { %750 = shalt.err (!%p747_p4)  }
   0xa   :  { %s849_s13 = smov [#allocation3]  }
   0xb   :  { %10 = dma.vmem_to_smem %s8_s11, 64, %s849_s13, [#allocation2] }
   0xc   :  { %823 = dma.done.wait [#allocation2], 64 }
   0xd   :  { %824 = vsyncadd [#allocation2], 4294967232 }
   0xe   :  { %12 = sfence }
   0xf   :  { %13 = vsyncpa [#allocation5], 0 }
  0x10   :  { %15 = vsyncpa [#allocation5 + $0x1], 0 }
  0x11   :  { %16 = vsyncpa [#allocation6], 0 }
  0x12   :  { %18 = vsyncpa [#allocation6 + $0x1], 0  ;;  %s874_s14 = smov 0   ;;  %s876_s0 = smov 0  }
  0x13   :  { %s878_s15 = smov 0   ;;  %s880_s16 = smov 0  }
  0x14 LB: > { %s895_s17 = sadd.s32 4294967295, %s847_s16   ;;  %s608_s18 = sadd.s32 4294967294, %s847_s16   ;;  %s847_s16 = sphi %s880_s16, %s1679_s16   ;;  %s843_s15 = sphi %s878_s15, %s1678_s15   ;;  %s839_s0 = sphi %s876_s0, %s1677_s0   ;;  %s835_s14 = sphi %s874_s14, %s1676_s14  }
  0x15   : > { %s899_s19 = sadd.s32 1, %s847_s16   ;;  %s31_s20 = sadd.s32 1, %s843_s15 }
  0x16   : > { %s28_s21 = ssub.s32 %s847_s16, %s899_s19  ;;  %p38_p5 = scmp.ne.s32.totalorder %s843_s15, %s839_s0 }
  0x17   : > { %p29_p6 = scmp.eq.s32.totalorder %s28_s21, 0  ;;  %p39_p7 = scmp.eq.s32.totalorder %s847_s16, 0 }
  0x18   : > { %p44_p8 = scmp.ne.s32.totalorder %s839_s0, %s835_s14  ;;  %p45_p9 = scmp.eq.s32.totalorder %s895_s17, 0 }
  0x19   : > { %s911_s22 = scalar_select %p29_p6, %s843_s15, %s31_s20  }
  0x1a   : > { %p40_p10 = por %p39_p7, %p38_p5  ;;  %p913_p11 = por %p45_p9, %p44_p8 }
  0x1b   : > { %p68_p12 = scmp.eq.s32.totalorder %s895_s17, 2  ;;  %p74_p13 = scmp.eq.s32.totalorder %s608_s18, 2 }
  0x1c   : > { %p610_p2 = scmp.ge.s32.totalorder %s847_s16, 3 }
  0x1d   : > { %p918_p0 = por %p68_p12, %p38_p5  ;;  %p922_p1 = por %p74_p13, %p44_p8 }
  0x1e   : > { %90 = sbr.rel (%p610_p2) target bundleno = 73 (0x49), region = 16 }
  0x1f   : > { %s1615_s25 = scalar_select %p922_p1, 1, 0 }
  0x25   : > { %93 = sbr.rel (!%p40_p10) target bundleno = 73 (0x49), region = 20  ;;  %s94_s26 = sand.u32 (%p40_p10), 1, %s843_s15  }
  0x26   : > { %s611_s27 = sshll.u32 (%p40_p10), %s847_s16, 1  ;;  %s691_s28 = smul.u32 (%p40_p10), 320, %s94_s26 }
  0x27   : > { %s100_s29 = ssub.s32 (%p40_p10), 5, %s611_s27  ;;  %s932_s4 = scalar_lea.sflag (%p40_p10), [#allocation5], %s94_s26 }
  0x28   : > { %p101_p3 = scmp.lt.s32.totalorder (%p40_p10), %s100_s29, 2  ;;  %s98_s5 = scalar_lea.vmem (%p40_p10), [#allocation4], %s691_s28 }
  0x2c   : > { %s1681_s29 = smov (!%p101_p3, %s100_s29), 2 }
  0x2d   : > { %s929_s30 = smul.u32 2560, %s1681_s29 }
  0x2f   : > { %s107_s3 = ssub.s32 5120, %s929_s30 }
  0x30   : > { %108 = vsyncadd %s932_s4, %s107_s3  ;;  %p615_p4 = scmp.ne.s32.totalorder %s929_s30, 0  ;;  %s692_s6 = smul.u32 5120, %s847_s16 }
  0x31   : > { %s115_s7 = sshll.u32 %s98_s5, 4  ;;  %s755_s18 = scalar_lea.hbm %s1611_s1, 12800  ;;  %s942_s7 = int_to_ptr.vmem [resolvable:$true] %s115_s7 }
  0x32   : > { %s940_s10 = scalar_lea.hbm %s1611_s1, %s692_s6 }
  0x33   : > { %s751_s11 = scalar_lea.hbm %s940_s10, %s929_s30  ;;  %p756_p8 = scmp.lt.u32.totalorder %s940_s10, %s1611_s1 }
  0x34   : > { %p752_p5 = scmp.ne.s32.totalorder %s940_s10, %s751_s11  ;;  %p757_p9 = scmp.lt.u32.totalorder %s755_s18, %s751_s11 }
  0x35   : > { %p759_p12 = scmp.lt.u32.totalorder %s751_s11, %s940_s10 }
  0x36   : > { %p753_p6 = pnand %p752_p5, %p615_p4  ;;  %p758_p10 = por %p757_p9, %p756_p8 }
  0x38   : > { %p754_p7 = pneg %p753_p6  ;;  %p760_p13 = por %p759_p12, %p758_p10 }
  0x3a   : > { %p761_p2 = pnand %p760_p13, %p754_p7 }
  0x3c   : > { %764 = shalt.err (!%p761_p2)
}
  0x3d   : > { %s765_s26 = scalar_lea.vmem %s942_s7, %s929_s30  ;;  %s850_s27 = smov [#allocation4]  }
  0x3e   : > { %p766_p3 = scmp.ne.s32.totalorder %s942_s7, %s765_s26  ;;  %s769_s28 = sshll.u32 %s850_s27, 4  ;;  %s770_s28 = int_to_ptr.vmem [resolvable:$false] %s769_s28 }
  0x3f   : > { %s771_s29 = scalar_lea.vmem %s770_s28, 10240  ;;  %p772_p1 = scmp.lt.s32.totalorder %s942_s7, %s770_s28 }
  0x40   : > { %p767_p5 = pnand %p766_p3, %p615_p4  ;;  %p773_p8 = scmp.lt.s32.totalorder %s771_s29, %s765_s26 }
  0x42   : > { %p768_p6 = pneg %p767_p5  ;;  %p774_p9 = por %p773_p8, %p772_p1 }
  0x44   : > { %p775_p10 = pnand %p774_p9, %p768_p6 }
  0x46   : > { %778 = shalt.err (!%p775_p10)
}
  0x47   : > { %s851_s3 = smov 256   ;;  %s852_s5 = smov 16  }
  0x48   : > { %121 = dma.hbm_to_vmem [thread:$0]  (%p615_p4), %s940_s10, %s929_s30, %s942_s7, %s932_s4, %s851_s3, %s851_s3, %s852_s5  }
  0x49 PF: > { %p620_p7 = scmp.ge.s32.totalorder %s847_s16, 1  ;;  %p123_p12 = scmp.lt.s32.totalorder %s847_s16, 4 }
  0x4b   : > { %p124_p13 = pnand %p620_p7, %p123_p12 }
  0x4c   : > { %s972_s6 = sand.u32 (!%p124_p13), 1, %s839_s0  }
  0x4d   : > { %127 = sbr.rel (%p124_p13) target bundleno = 177 (0xb1), region = 24  ;;  %s130_s9 = scalar_lea.sflag (!%p124_p13), [#allocation5], %s972_s6 }
  0x4e   : > { %s693_s8 = smul.u32 (!%p124_p13), 320, %s972_s6 }
  0x50   : > { %s978_s11 = scalar_lea.vmem (!%p124_p13), [#allocation4], %s693_s8 }
  0x54   : > { %826 = dma.done.wait (%p913_p11), %s130_s9, 5120  }
  0x55   : > { %828 = vsyncadd (%p913_p11), %s130_s9, 4294962176  ;;  %v166_v0 = vlaneseq  ;;  %s985_s30 = sshll.u32 %s895_s17, 1  ;;  %v240_v18 = vld [vmem:[%s978_s11] sm:$0xff]  ;;  %v242_v19 = vld [vmem:[%s978_s11 + $0x10] sm:$0xff] }
  0x56   : > { %s988_s4 = sld [smem:[#allocation3 + %s985_s30]]  ;;  %s182_s7 = sshra.s32 %s985_s30, 7  ;;  %v244_v23 = vld [vmem:[%s978_s11 + $0x20] sm:$0xff]  ;;  %v246_v24 = vld [vmem:[%s978_s11 + $0x30] sm:$0xff]  ;;  %v241_v26 = vld [vmem:[%s978_s11 + $0x8] sm:$0xff] }
  0x57   : > { %s679_s10 = sshll.u32 %s182_s7, 7  ;;  %s187_s12 = sand.u32 127, %s985_s30  ;;  %v992_v1 = vshrl.u32 %v166_v0, 7  ;;  %v998_v2 = vand.u32 127, %v166_v0  ;;  %v243_v27 = vld [vmem:[%s978_s11 + $0x18] sm:$0xff]  ;;  %v245_v30 = vld [vmem:[%s978_s11 + $0x28] sm:$0xff] }
  0x58   : > { %s680_s13 = sadd.s32 128, %s679_s10  ;;  %s682_s18 = sadd.s32 256, %s679_s10  ;;  %v247_v36 = vld [vmem:[%s978_s11 + $0x38] sm:$0xff]  ;;  %v248_v37 = vld [vmem:[%s978_s11 + $0x40] sm:$0xff]  ;;  %v249_v43 = vld [vmem:[%s978_s11 + $0x48] sm:$0xff] }
  0x59   : > { %s188_s23 = sadd.s32 %s680_s13, %s187_s12  ;;  %s192_s20 = sadd.s32 %s682_s18, %s187_s12  ;;  %v1002_v3 = vadd.s32 8, %v992_v1  ;;  %v1005_v4 = vadd.s32 16, %v992_v1  ;;  %v1015_v6 = vadd.s32 24, %v992_v1  ;;  %v1018_v7 = vadd.s32 32, %v992_v1  ;;  %v250_v44 = vld [vmem:[%s978_s11 + $0x50] sm:$0xff]  ;;  %v251_v50 = vld [vmem:[%s978_s11 + $0x58] sm:$0xff] }
  0x5a   : > { %s994_s21 = sld [smem:[#allocation3 + %s188_s23]]  ;;  %s684_s27 = sadd.s32 384, %s679_s10  ;;  %v1021_v8 = vadd.s32 40, %v992_v1  ;;  %v1024_v9 = vadd.s32 48, %v992_v1  ;;  %v1031_v10 = vadd.s32 128, %v998_v2  ;;  %v1034_v11 = vadd.s32 56, %v992_v1 }
  0x5b   : > { %s996_s26 = sld [smem:[#allocation3 + %s192_s20]]  ;;  %s345_s28 = sadd.s32 1, %s985_s30  ;;  %v1037_v12 = vadd.s32 64, %v992_v1  ;;  %v1040_v13 = vadd.s32 72, %v992_v1  ;;  %v252_v51 = vld [vmem:[%s978_s11 + $0x60] sm:$0xff]  ;;  %v253_v57 = vld [vmem:[%s978_s11 + $0x68] sm:$0xff] }
  0x5c   : > { %s196_s29 = sadd.s32 %s684_s27, %s187_s12  ;;  %s1007_s3 = sld [smem:[#allocation3 + %s345_s28]]  ;;  %v1012_v5 = vstv %s988_s4  ;;  %v254_v58 = vld [vmem:[%s978_s11 + $0x70] sm:$0xff]  ;;  %v255_v0 = vld [vmem:[%s978_s11 + $0x78] sm:$0xff]  ;;  %v257_v21 = vld [vmem:[%s978_s11 + $0x88] sm:$0xff] }
  0x5d   : > { %s1009_s5 = sld [smem:[#allocation3 + %s196_s29]]  ;;  %s347_s9 = sshra.s32 %s345_s28, 7  ;;  %vm199_vm1 = vcmp.ge.s32.totalorder %v992_v1, %v1012_v5  ;;  %vm200_vm2 = vcmp.ge.s32.totalorder %v1002_v3, %v1012_v5  ;;  %vm201_vm3 = vcmp.ge.s32.totalorder %v1005_v4, %v1012_v5  ;;  %vm202_vm4 = vcmp.ge.s32.totalorder %v1015_v6, %v1012_v5  ;;  %v258_v22 = vld [vmem:[%s978_s11 + $0x90] sm:$0xff]  ;;  %v629_v29 = vld [vmem:[%s978_s11 + $0xa8] sm:$0xff]  ;;  %v636_v56 = vld [vmem:[%s978_s11 + $0xe0] sm:$0xff] }
  0x5e   : > { %s1026_s7 = sshll.u32 %s347_s9, 7  ;;  %s1028_s10 = sand.u32 127, %s345_s28  ;;  %vm203_vm5 = vcmp.ge.s32.totalorder %v1018_v7, %v1012_v5  ;;  %v643_v28 = vld [vmem:[%s978_s11 + $0x118] sm:$0xff] }
  0x5f   : > { %s686_s12 = sadd.s32 128, %s1026_s7  ;;  %s688_s13 = sadd.s32 256, %s1026_s7 }
  0x60   : > { %s209_s18 = sadd.s32 %s994_s21, %s988_s4  ;;  %s353_s4 = sadd.s32 %s686_s12, %s1028_s10 }
  0x61   : > { %v231_v14 = vstv %s996_s26  ;;  %v1053_v15 = vstv %s209_s18  ;;  %s1071_s23 = sadd.s32 %s688_s13, %s1028_s10  ;;  %s690_s20 = sadd.s32 384, %s1026_s7 }
  0x62   : > { %vm211_vm7 = vcmp.lt.s32.totalorder %v992_v1, %v1053_v15  ;;  %vm212_vm8 = vcmp.lt.s32.totalorder %v1002_v3, %v1053_v15  ;;  %vm213_vm9 = vcmp.lt.s32.totalorder %v1005_v4, %v1053_v15  ;;  %vm1082_vm12 = vcmp.ge.s32.totalorder %v998_v2, %v231_v14  ;;  %s361_s27 = sadd.s32 %s690_s20, %s1028_s10  ;;  %s1155_s28 = sld [smem:[#allocation3 + %s1071_s23]] }
  0x63   : > { %vm1077_vm11 = vmand %vm199_vm1, %vm211_vm7  ;;  %s234_s21 = sadd.s32 %s1009_s5, %s996_s26  ;;  %vm1098_vm1 = vcmp.ge.s32.totalorder %v1031_v10, %v231_v14  ;;  %vm214_vm15 = vcmp.lt.s32.totalorder %v1015_v6, %v1053_v15  ;;  %v1117_v25 = vstv %s1007_s3  ;;  %s1137_s26 = sld [smem:[#allocation3 + %s353_s4]]  ;;  %vm219_vm0 = vcmp.lt.s32.totalorder %v1037_v12, %v1053_v15  ;;  %v256_v14 = vld [vmem:[%s978_s11 + $0x80] sm:$0xff] }
  0x64   : > { %v235_v20 = vstv %s234_s21  ;;  %vm1108_vm7 = vmand %vm200_vm2, %vm212_vm8  ;;  %vm215_vm8 = vcmp.lt.s32.totalorder %v1018_v7, %v1053_v15  ;;  %vm220_vm10 = vcmp.lt.s32.totalorder %v1040_v13, %v1053_v15  ;;  %s1157_s29 = sld [smem:[#allocation3 + %s361_s27]]  ;;  %s1201_s5 = scalar_lea.vmem [#allocation7], %s693_s8 }
  0x65   : > { %vm236_vm14 = vcmp.lt.s32.totalorder %v998_v2, %v235_v20  ;;  %vm237_vm13 = vcmp.lt.s32.totalorder %v1031_v10, %v235_v20  ;;  %vm1129_vm2 = vmand %vm201_vm3, %vm213_vm9  ;;  %vm217_vm3 = vcmp.lt.s32.totalorder %v1024_v9, %v1053_v15  ;;  %vm218_vm9 = vcmp.lt.s32.totalorder %v1034_v11, %v1053_v15  ;;  %v640_v20 = vld [vmem:[%s978_s11 + $0x100] sm:$0xff]  ;;  %s520_s9 = ssub.s32 (%p918_p0), 5, %s985_s30 }
  0x66   : > { %vm1141_vm6 = vmand %vm1082_vm12, %vm236_vm14  ;;  %vm364_vm14 = vcmp.ge.s32.totalorder %v992_v1, %v1117_v25  ;;  %p521_p11 = scmp.lt.s32.totalorder (%p918_p0), %s520_s9, 2 }
  0x67   : > { %v264_v31 = vsel %vm1141_vm6, 0.0, %v240_v18  ;;  %vm1165_vm12 = vmand %vm1098_vm1, %vm237_vm13  ;;  %v266_v33 = vsel %vm1141_vm6, 0.0, %v242_v19  ;;  %v268_v34 = vsel %vm1141_vm6, 0.0, %v244_v23  ;;  %v270_v35 = vsel %vm1141_vm6, 0.0, %v246_v24 }
  0x68   : > { %v304_v38 = vsel %vm1077_vm11, 0.0, %v264_v31  ;;  %v265_v39 = vsel %vm1165_vm12, 0.0, %v241_v26  ;;  %v306_v40 = vsel %vm1108_vm7, 0.0, %v266_v33  ;;  %v267_v41 = vsel %vm1165_vm12, 0.0, %v243_v27  ;;  %vm1193_vm13 = vmand %vm202_vm4, %vm214_vm15 }
  0x69   : > { %324 = vst [vmem:[%s1201_s5] sm:$0xff] %v304_v38  ;;  %v305_v45 = vsel %vm1077_vm11, 0.0, %v265_v39  ;;  %327 = vst [vmem:[%s1201_s5 + $0x10] sm:$0xff] %v306_v40  ;;  %v307_v46 = vsel %vm1108_vm7, 0.0, %v267_v41  ;;  %v308_v47 = vsel %vm1129_vm2, 0.0, %v268_v34  ;;  %v269_v48 = vsel %vm1165_vm12, 0.0, %v245_v30  ;;  %v259_v30 = vld [vmem:[%s978_s11 + $0x98] sm:$0xff]  ;;  %s374_s8 = sadd.s32 %s1137_s26, %s1007_s3 }
  0x6a   : > { %vm1219_vm4 = vmand %vm203_vm5, %vm215_vm8  ;;  %vm1634_vm11 = vcmask 588800   ;;  %329 = vst [vmem:[%s1201_s5 + $0x20] sm:$0xff] %v308_v47  ;;  %v309_v52 = vsel %vm1129_vm2, 0.0, %v269_v48  ;;  %v310_v53 = vsel %vm1193_vm13, 0.0, %v270_v35  ;;  %v271_v54 = vsel %vm1165_vm12, 0.0, %v247_v36  ;;  %s399_s3 = sadd.s32 %s1157_s29, %s1155_s28  ;;  %v632_v47 = vld [vmem:[%s978_s11 + $0xc0] sm:$0xff] }
  0x6b   : > { %326 = vst.msk [vmem:[%s1201_s5 + $0x8] sm:$0xff] %vm1634_vm11, %v305_v45  ;;  %vm1635_vm15 = vmmov %vm1634_vm11  ;;  %v272_v55 = vsel %vm1141_vm6, 0.0, %v248_v37  ;;  %vm1636_vm5 = vcmp.lt.s32.totalorder %v1021_v8, %v1053_v15  ;;  %vm1637_vm1 = vcmp.ge.s32.totalorder %v1021_v8, %v1012_v5  ;;  %vm365_vm2 = vcmp.ge.s32.totalorder %v1002_v3, %v1117_v25  ;;  %v634_v48 = vld [vmem:[%s978_s11 + $0xd0] sm:$0xff] }
  0x6c   : > { %328 = vst.msk [vmem:[%s1201_s5 + $0x18] sm:$0xff] %vm1635_vm15, %v307_v46  ;;  %vm1244_vm7 = vmand %vm1637_vm1, %vm1636_vm5  ;;  %v311_v59 = vsel %vm1193_vm13, 0.0, %v271_v54  ;;  %v312_v60 = vsel %vm1219_vm4, 0.0, %v272_v55  ;;  %v273_v61 = vsel %vm1165_vm12, 0.0, %v249_v43  ;;  %v274_v62 = vsel %vm1141_vm6, 0.0, %v250_v44  ;;  %v628_v43 = vld [vmem:[%s978_s11 + $0xa0] sm:$0xff] }
  0x6d   : > { %vm1640_vm8 = vmmov %vm1634_vm11  ;;  %331 = vst [vmem:[%s1201_s5 + $0x30] sm:$0xff] %v310_v53  ;;  %vm1641_vm11 = vcmp.ge.s32.totalorder %v1024_v9, %v1012_v5  ;;  %vm366_vm13 = vcmp.ge.s32.totalorder %v1005_v4, %v1117_v25  ;;  %v313_v16 = vsel %vm1219_vm4, 0.0, %v273_v61  ;;  %v314_v17 = vsel %vm1244_vm7, 0.0, %v274_v62  ;;  %v630_v44 = vld [vmem:[%s978_s11 + $0xb0] sm:$0xff] }
  0x6e   : > { %330 = vst.msk [vmem:[%s1201_s5 + $0x28] sm:$0xff] %vm1640_vm8, %v309_v52  ;;  %vm1269_vm15 = vmand %vm1641_vm11, %vm217_vm3  ;;  %v275_v18 = vsel %vm1165_vm12, 0.0, %v251_v50  ;;  %v276_v19 = vsel %vm1141_vm6, 0.0, %v252_v51  ;;  %vm1645_vm3 = vcmp.ge.s32.totalorder %v1034_v11, %v1012_v5  ;;  %vm367_vm1 = vcmp.ge.s32.totalorder %v1015_v6, %v1117_v25  ;;  %v631_v50 = vld [vmem:[%s978_s11 + $0xb8] sm:$0xff]  ;;  %v633_v51 = vld [vmem:[%s978_s11 + $0xc8] sm:$0xff] }
  0x6f   : > { %vm1644_vm5 = vmmov %vm1640_vm8  ;;  %333 = vst [vmem:[%s1201_s5 + $0x40] sm:$0xff] %v312_v60  ;;  %v315_v23 = vsel %vm1244_vm7, 0.0, %v275_v18  ;;  %v316_v24 = vsel %vm1269_vm15, 0.0, %v276_v19  ;;  %v277_v26 = vsel %vm1165_vm12, 0.0, %v253_v57  ;;  %v278_v27 = vsel %vm1141_vm6, 0.0, %v254_v58  ;;  %v637_v57 = vld [vmem:[%s978_s11 + $0xe8] sm:$0xff] }
  0x70   : > { %332 = vst.msk [vmem:[%s1201_s5 + $0x38] sm:$0xff] %vm1644_vm5, %v311_v59  ;;  %vm1294_vm4 = vmand %vm1645_vm3, %vm218_vm9  ;;  %vm1649_vm9 = vcmp.ge.s32.totalorder %v1037_v12, %v1012_v5  ;;  %vm368_vm7 = vcmp.ge.s32.totalorder %v1018_v7, %v1117_v25  ;;  %v317_v31 = vsel %vm1269_vm15, 0.0, %v277_v26  ;;  %v279_v34 = vsel %vm1165_vm12, 0.0, %v255_v0  ;;  %v638_v62 = vld [vmem:[%s978_s11 + $0xf0] sm:$0xff] }
  0x71   : > { %vm1648_vm8 = vmmov %vm1644_vm5  ;;  %335 = vst [vmem:[%s1201_s5 + $0x50] sm:$0xff] %v314_v17  ;;  %v318_v33 = vsel %vm1294_vm4, 0.0, %v278_v27  ;;  %v280_v35 = vsel %vm1141_vm6, 0.0, %v256_v14  ;;  %vm369_vm15 = vcmp.ge.s32.totalorder %v1021_v8, %v1117_v25  ;;  %v319_v15 = vsel %vm1294_vm4, 0.0, %v279_v34  ;;  %v646_v36 = vld [vmem:[%s978_s11 + $0x130] sm:$0xff] }
  0x72   : > { %334 = vst.msk [vmem:[%s1201_s5 + $0x48] sm:$0xff] %vm1648_vm8, %v313_v16  ;;  %vm1319_vm11 = vmand %vm1649_vm9, %vm219_vm0  ;;  %vm1652_vm0 = vcmp.ge.s32.totalorder %v1040_v13, %v1012_v5  ;;  %v281_v37 = vsel %vm1165_vm12, 0.0, %v257_v21  ;;  %v282_v38 = vsel %vm1141_vm6, 0.0, %v258_v22  ;;  %v283_v41 = vsel %vm1165_vm12, 0.0, %v259_v30  ;;  %v639_v16 = vld [vmem:[%s978_s11 + $0xf8] sm:$0xff] }
  0x73   : > { %336 = vst.msk [vmem:[%s1201_s5 + $0x58] sm:$0xff] %vm1644_vm5, %v315_v23  ;;  %337 = vst [vmem:[%s1201_s5 + $0x60] sm:$0xff] %v316_v24  ;;  %v320_v5 = vsel %vm1319_vm11, 0.0, %v280_v35  ;;  %v321_v39 = vsel %vm1319_vm11, 0.0, %v281_v37  ;;  %v1373_v42 = vstv %s374_s8  ;;  %v396_v46 = vstv %s1155_s28 }
  0x74   : > { %vm1345_vm3 = vmand %vm1652_vm0, %vm220_vm10  ;;  %339 = vst [vmem:[%s1201_s5 + $0x70] sm:$0xff] %v318_v33  ;;  %vm376_vm4 = vcmp.lt.s32.totalorder %v992_v1, %v1373_v42  ;;  %v400_v32 = vstv %s399_s3  ;;  %vm397_vm11 = vcmp.ge.s32.totalorder %v998_v2, %v396_v46  ;;  %vm398_vm0 = vcmp.ge.s32.totalorder %v1031_v10, %v396_v46  ;;  %v635_v1 = vld [vmem:[%s978_s11 + $0xd8] sm:$0xff]  ;;  %v641_v23 = vld [vmem:[%s978_s11 + $0x108] sm:$0xff] }
  0x75   : > { %vm1655_vm8 = vmmov %vm1644_vm5  ;;  %341 = vst [vmem:[%s1201_s5 + $0x80] sm:$0xff] %v320_v5  ;;  %v322_v40 = vsel %vm1345_vm3, 0.0, %v282_v38  ;;  %v323_v45 = vsel %vm1345_vm3, 0.0, %v283_v41  ;;  %vm402_vm3 = vcmp.lt.s32.totalorder %v1031_v10, %v400_v32  ;;  %v642_v24 = vld [vmem:[%s978_s11 + $0x110] sm:$0xff]  ;;  %v644_v33 = vld [vmem:[%s978_s11 + $0x120] sm:$0xff] }
  0x76   : > { %338 = vst.msk [vmem:[%s1201_s5 + $0x68] sm:$0xff] %vm1655_vm8, %v317_v31  ;;  %vm1656_vm10 = vmmov %vm1644_vm5  ;;  %v645_v35 = vld [vmem:[%s978_s11 + $0x128] sm:$0xff]  ;;  %v647_v38 = vld [vmem:[%s978_s11 + $0x138] sm:$0xff]  ;;  %s512_s11 = scalar_lea.sflag [#allocation6], %s972_s6 }
  0x77   : > { %340 = vst.msk [vmem:[%s1201_s5 + $0x78] sm:$0xff] %vm1656_vm10, %v319_v15  ;;  %vm1657_vm6 = vmmov %vm1644_vm5  ;;  %vm378_vm10 = vcmp.lt.s32.totalorder %v1005_v4, %v1373_v42 }
  0x78   : > { %342 = vst.msk [vmem:[%s1201_s5 + $0x88] sm:$0xff] %vm1657_vm6, %v321_v39  ;;  %343 = vst [vmem:[%s1201_s5 + $0x90] sm:$0xff] %v322_v40  ;;  %vm379_vm6 = vcmp.lt.s32.totalorder %v1015_v6, %v1373_v42 }
  0x79   : > { %vm1658_vm12 = vmmov %vm1644_vm5  ;;  %vm401_vm5 = vcmp.lt.s32.totalorder %v998_v2, %v400_v32 }
  0x7a   : > { %344 = vst.msk [vmem:[%s1201_s5 + $0x98] sm:$0xff] %vm1658_vm12, %v323_v45  ;;  %vm1393_vm9 = vmand %vm364_vm14, %vm376_vm4  ;;  %vm377_vm14 = vcmp.lt.s32.totalorder %v1002_v3, %v1373_v42  ;;  %vm380_vm4 = vcmp.lt.s32.totalorder %v1018_v7, %v1373_v42 }
  0x7b   : > { %vm1403_vm8 = vmand %vm397_vm11, %vm401_vm5  ;;  %vm1665_vm5 = vcmask 588800  }
  0x7c   : > { %v430_v2 = vsel %vm1403_vm8, 0.0, %v628_v43  ;;  %vm1418_vm12 = vmand %vm398_vm0, %vm402_vm3  ;;  %v432_v53 = vsel %vm1403_vm8, 0.0, %v630_v44  ;;  %v434_v54 = vsel %vm1403_vm8, 0.0, %v632_v47  ;;  %v436_v55 = vsel %vm1403_vm8, 0.0, %v634_v48 }
  0x7d   : > { %v470_v58 = vsel %vm1393_vm9, 0.0, %v430_v2  ;;  %v431_v59 = vsel %vm1418_vm12, 0.0, %v629_v29  ;;  %vm387_vm11 = vmand %vm365_vm2, %vm377_vm14  ;;  %v433_v60 = vsel %vm1418_vm12, 0.0, %v631_v50  ;;  %v435_v61 = vsel %vm1418_vm12, 0.0, %v633_v51 }
  0x7e   : > { %648 = vst [vmem:[%s1201_s5 + $0xa0] sm:$0xff] %v470_v58  ;;  %v471_v63 = vsel %vm1393_vm9, 0.0, %v431_v59  ;;  %v472_v0 = vsel %vm387_vm11, 0.0, %v432_v53  ;;  %v473_v14 = vsel %vm387_vm11, 0.0, %v433_v60  ;;  %vm388_vm2 = vmand %vm366_vm13, %vm378_vm10  ;;  %v437_v3 = vsel %vm1418_vm12, 0.0, %v635_v1 }
  0x7f   : > { %649 = vst.msk [vmem:[%s1201_s5 + $0xa8] sm:$0xff] %vm1665_vm5, %v471_v63  ;;  %650 = vst [vmem:[%s1201_s5 + $0xb0] sm:$0xff] %v472_v0  ;;  %v474_v17 = vsel %vm388_vm2, 0.0, %v434_v54  ;;  %v475_v18 = vsel %vm388_vm2, 0.0, %v435_v61  ;;  %v438_v4 = vsel %vm1403_vm8, 0.0, %v636_v56  ;;  %v439_v19 = vsel %vm1418_vm12, 0.0, %v637_v57 }
  0x80   : > { %vm1666_vm0 = vmmov %vm1665_vm5  ;;  %652 = vst [vmem:[%s1201_s5 + $0xc0] sm:$0xff] %v474_v17  ;;  %vm381_vm3 = vcmp.lt.s32.totalorder %v1021_v8, %v1373_v42  ;;  %v440_v6 = vsel %vm1403_vm8, 0.0, %v638_v62  ;;  %v441_v7 = vsel %vm1418_vm12, 0.0, %v639_v16  ;;  %vm370_vm10 = vcmp.ge.s32.totalorder %v1024_v9, %v1117_v25 }
  0x81   : > { %651 = vst.msk [vmem:[%s1201_s5 + $0xb8] sm:$0xff] %vm1666_vm0, %v473_v14  ;;  %vm389_vm13 = vmand %vm367_vm1, %vm379_vm6  ;;  %v442_v8 = vsel %vm1403_vm8, 0.0, %v640_v20  ;;  %v443_v34 = vsel %vm1418_vm12, 0.0, %v641_v23  ;;  %vm371_vm2 = vcmp.ge.s32.totalorder %v1034_v11, %v1117_v25  ;;  %vm383_vm5 = vcmp.lt.s32.totalorder %v1034_v11, %v1373_v42 }
  0x82   : > { %vm1667_vm9 = vmmov %vm1666_vm0  ;;  %v476_v21 = vsel %vm389_vm13, 0.0, %v436_v55  ;;  %v477_v22 = vsel %vm389_vm13, 0.0, %v437_v3  ;;  %v445_v37 = vsel %vm1418_vm12, 0.0, %v643_v28  ;;  %vm372_vm13 = vcmp.ge.s32.totalorder %v1037_v12, %v1117_v25 }
  0x83   : > { %653 = vst.msk [vmem:[%s1201_s5 + $0xc8] sm:$0xff] %vm1667_vm9, %v475_v18  ;;  %vm390_vm1 = vmand %vm368_vm7, %vm380_vm4  ;;  %vm382_vm4 = vcmp.lt.s32.totalorder %v1024_v9, %v1373_v42  ;;  %v444_v9 = vsel %vm1403_vm8, 0.0, %v642_v24  ;;  %v446_v40 = vsel %vm1403_vm8, 0.0, %v644_v33  ;;  %v447_v41 = vsel %vm1418_vm12, 0.0, %v645_v35 }
  0x84   : > { %654 = vst [vmem:[%s1201_s5 + $0xd0] sm:$0xff] %v476_v21  ;;  %vm1668_vm14 = vmmov %vm1666_vm0  ;;  %v478_v26 = vsel %vm390_vm1, 0.0, %v438_v4  ;;  %v479_v27 = vsel %vm390_vm1, 0.0, %v439_v19  ;;  %vm384_vm1 = vcmp.lt.s32.totalorder %v1037_v12, %v1373_v42  ;;  %v448_v12 = vsel %vm1403_vm8, 0.0, %v646_v36 }
  0x85   : > { %655 = vst.msk [vmem:[%s1201_s5 + $0xd8] sm:$0xff] %vm1668_vm14, %v477_v22  ;;  %vm391_vm7 = vmand %vm369_vm15, %vm381_vm3  ;;  %v449_v44 = vsel %vm1418_vm12, 0.0, %v647_v38 }
  0x86   : > { %656 = vst [vmem:[%s1201_s5 + $0xe0] sm:$0xff] %v478_v26  ;;  %vm1669_vm6 = vmmov %vm1666_vm0  ;;  %v480_v30 = vsel %vm391_vm7, 0.0, %v440_v6  ;;  %v481_v31 = vsel %vm391_vm7, 0.0, %v441_v7  ;;  %vm373_vm7 = vcmp.ge.s32.totalorder %v1040_v13, %v1117_v25 }
  0x87   : > { %657 = vst.msk [vmem:[%s1201_s5 + $0xe8] sm:$0xff] %vm1669_vm6, %v479_v27  ;;  %658 = vst [vmem:[%s1201_s5 + $0xf0] sm:$0xff] %v480_v30 }
  0x88   : > { %vm1670_vm15 = vmmov %vm1666_vm0 }
  0x89   : > { %659 = vst.msk [vmem:[%s1201_s5 + $0xf8] sm:$0xff] %vm1670_vm15, %v481_v31  ;;  %vm392_vm11 = vmand %vm370_vm10, %vm382_vm4  ;;  %vm385_vm10 = vcmp.lt.s32.totalorder %v1040_v13, %v1373_v42 }
  0x8a   : > { %v482_v15 = vsel %vm392_vm11, 0.0, %v442_v8  ;;  %v483_v5 = vsel %vm392_vm11, 0.0, %v443_v34  ;;  %vm393_vm0 = vmand %vm371_vm2, %vm383_vm5 }
  0x8b   : > { %660 = vst [vmem:[%s1201_s5 + $0x100] sm:$0xff] %v482_v15  ;;  %vm1671_vm9 = vmmov %vm1669_vm6  ;;  %v484_v11 = vsel %vm393_vm0, 0.0, %v444_v9  ;;  %v485_v39 = vsel %vm393_vm0, 0.0, %v445_v37 }
  0x8c   : > { %661 = vst.msk [vmem:[%s1201_s5 + $0x108] sm:$0xff] %vm1671_vm9, %v483_v5  ;;  %662 = vst [vmem:[%s1201_s5 + $0x110] sm:$0xff] %v484_v11 }
  0x8d   : > { %vm1672_vm3 = vmmov %vm1669_vm6  ;;  %518 = sbr.rel (!%p918_p0) target bundleno = 177 (0xb1), region = 32 }
  0x8e   : > { %663 = vst.msk [vmem:[%s1201_s5 + $0x118] sm:$0xff] %vm1672_vm3, %v485_v39  ;;  %vm394_vm14 = vmand %vm372_vm13, %vm384_vm1 }
  0x8f   : > { %v486_v43 = vsel %vm394_vm14, 0.0, %v446_v40  ;;  %v487_v29 = vsel %vm394_vm14, 0.0, %v447_v41  ;;  %vm395_vm6 = vmand %vm373_vm7, %vm385_vm10 }
  0x90   : > { %664 = vst [vmem:[%s1201_s5 + $0x120] sm:$0xff] %v486_v43  ;;  %vm1673_vm4 = vmmov %vm1672_vm3  ;;  %v488_v45 = vsel %vm395_vm6, 0.0, %v448_v12  ;;  %v489_v46 = vsel %vm395_vm6, 0.0, %v449_v44 }
  0x91   : > { %665 = vst.msk [vmem:[%s1201_s5 + $0x128] sm:$0xff] %vm1673_vm4, %v487_v29  ;;  %666 = vst [vmem:[%s1201_s5 + $0x130] sm:$0xff] %v488_v45 }
  0x92   : > { %vm1674_vm15 = vmmov %vm1672_vm3 }
  0x93   : > { %667 = vst.msk [vmem:[%s1201_s5 + $0x138] sm:$0xff] %vm1674_vm15, %v489_v46 }
  0x94   : > { %s1683_s9 = smov (!%p521_p11, %s520_s9), 2 }
  0x95   : > { %s1552_s7 = smul.u32 2560, %s1683_s9 }
  0x97   : > { %s527_s10 = ssub.s32 5120, %s1552_s7 }
  0x98   : > { %528 = vsyncadd %s512_s11, %s527_s10  ;;  %p672_p1 = scmp.ne.s32.totalorder %s1552_s7, 0  ;;  %s694_s12 = smul.u32 5120, %s895_s17 }
  0x99   : > { %s535_s24 = sshll.u32 %s1201_s5, 4  ;;  %s853_s23 = smov [#allocation7]   ;;  %s1565_s24 = int_to_ptr.vmem [resolvable:$true] %s535_s24 }
  0x9a   : > { %s1563_s30 = scalar_lea.hbm %s1612_s2, %s694_s12  ;;  %s779_s4 = scalar_lea.vmem %s1565_s24, %s1552_s7 }
  0x9b   : > { %p780_p0 = scmp.ne.s32.totalorder %s1565_s24, %s779_s4  ;;  %s783_s20 = sshll.u32 %s853_s23, 4  ;;  %s784_s20 = int_to_ptr.vmem [resolvable:$false] %s783_s20 }
  0x9c   : > { %s785_s17 = scalar_lea.vmem %s784_s20, 10240  ;;  %p786_p3 = scmp.lt.s32.totalorder %s1565_s24, %s784_s20 }
  0x9d   : > { %p781_p4 = pnand %p780_p0, %p672_p1  ;;  %p787_p5 = scmp.lt.s32.totalorder %s785_s17, %s779_s4 }
  0x9f   : > { %p782_p2 = pneg %p781_p4  ;;  %p788_p6 = por %p787_p5, %p786_p3 }
  0xa1   : > { %p789_p8 = pnand %p788_p6, %p782_p2 }
  0xa3   : > { %792 = shalt.err (!%p789_p8)
}
  0xa4   : > { %s793_s21 = scalar_lea.hbm %s1563_s30, %s1552_s7  ;;  %s797_s28 = scalar_lea.hbm %s1612_s2, 12800 }
  0xa5   : > { %p794_p9 = scmp.ne.s32.totalorder %s1563_s30, %s793_s21  ;;  %p798_p12 = scmp.lt.u32.totalorder %s1563_s30, %s1612_s2 }
  0xa6   : > { %p799_p13 = scmp.lt.u32.totalorder %s797_s28, %s793_s21  ;;  %p801_p0 = scmp.lt.u32.totalorder %s793_s21, %s1563_s30 }
  0xa7   : > { %p795_p10 = pnand %p794_p9, %p672_p1 }
  0xa8   : > { %p800_p11 = por %p799_p13, %p798_p12 }
  0xa9   : > { %p796_p7 = pneg %p795_p10 }
  0xaa   : > { %p802_p4 = por %p801_p0, %p800_p11 }
  0xac   : > { %p803_p2 = pnand %p802_p4, %p796_p7 }
  0xae   : > { %806 = shalt.err (!%p803_p2)
}
  0xaf   : > { %s854_s8 = smov 256   ;;  %s855_s3 = smov 16  }
  0xb0   : > { %541 = dma.vmem_to_hbm [thread:$0]  (%p672_p1), %s1565_s24, %s1552_s7, %s1563_s30, %s512_s11, %s854_s8, %s854_s8, %s855_s3  }
  0xb1 PF: > { %p701_p3 = scmp.ge.s32.totalorder %s847_s16, 2  ;;  %s550_s9 = sand.u32 1, %s835_s14  }
  0xb2   : > { %p1675_p5 = scmp.ne.s32.totalorder %s1615_s25, 0  ;;  %s551_s10 = scalar_lea.sflag [#allocation6], %s550_s9 }
  0xb4   : > { %p698_p6 = pnand %p701_p3, %p1675_p5 }
  0xb6   : > { %830 = dma.done.wait (!%p698_p6), %s551_s10, 5120  }
  0xb7   : > { %832 = vsyncadd (!%p698_p6), %s551_s10, 4294962176  ;;  %p21_p8 = scmp.ge.s32.totalorder %s899_s19, 5   ;;  %s1676_s14 = smov %s839_s0 }
  0xb8   : > { %s1677_s0 = smov %s843_s15  ;;  %s1678_s15 = smov %s911_s22 }
  0xb9   : > { %s1679_s16 = smov %s899_s19  ;;  %23 = sbr.rel (!%p21_p8) target bundleno = 20 (0x14), region = 71 }
  0xc0   :  { %556 = vsyncpa [#allocation5], 1 }
  0xc1   :  { %558 = vsyncpa [#allocation5 + $0x1], 1 }
  0xc2   :  { %559 = vsyncpa [#allocation6], 1 }
  0xc3   :  { %561 = vsyncpa [#allocation6 + $0x1], 1 }

</bundles_post_ra>
